<compile_context>
chip_gen: v5e
topology: v5e:2x2
jax: 0.10.0
libtpu: 0.0.40
codegen_flags: <defaults>
</compile_context>

<pallas_src>
from functools import lru_cache

import numpy as np
import jax
import jax.numpy as jnp
from jax.experimental import pallas as pl
from jax.experimental.pallas import tpu as pltpu


# ------------------------------------------------------------ tiling helpers

def _pick_block(n, cap, mult):
    """Largest multiple of `mult` that divides n and is <= cap (falls back to n)."""
    if n <= cap:
        return n
    t = (cap // mult) * mult
    while t >= mult:
        if n % t == 0:
            return t
        t -= mult
    return n


# ----------------------------------------------------- interpolation weights

@lru_cache(maxsize=None)
def _linear_interp_matrix(out_size, in_size):
    """1-D linear interpolation (PyTorch align_corners=False) as (out,in) matrix."""
    scale = in_size / out_size
    o = np.arange(out_size, dtype=np.float64)
    src = np.maximum((o + 0.5) * scale - 0.5, 0.0)          # half-pixel centers
    i0 = np.minimum(np.floor(src).astype(np.int64), in_size - 1)
    i1 = np.minimum(i0 + 1, in_size - 1)
    w1 = (src - i0).astype(np.float32)
    w0 = (1.0 - w1).astype(np.float32)
    m = np.zeros((out_size, in_size), dtype=np.float32)
    m[np.arange(out_size), i0] += w0
    m[np.arange(out_size), i1] += w1
    return m


# ------------------------------------------------------ separable interp MXU

def _rmm_kernel(x_ref, w_ref, o_ref):
    # (TM, K) @ (K, N): the big (flattened spatial) dimension is M.
    o_ref[...] = jnp.dot(x_ref[...], w_ref[...], preferred_element_type=jnp.float32)


def _right_matmul(x2d, w2d, tm_cap=1024):
    """out = x2d @ w2d, tiled (and pipelined) over rows of x2d."""
    M, K = x2d.shape
    _, N = w2d.shape
    tm = _pick_block(M, tm_cap, 8)
    return pl.pallas_call(
        _rmm_kernel,
        out_shape=jax.ShapeDtypeStruct((M, N), jnp.float32),
        grid_spec=pltpu.PrefetchScalarGridSpec(
            num_scalar_prefetch=0, grid=(M // tm,),
            in_specs=[pl.BlockSpec((tm, K), lambda i: (i, 0)),
                      pl.BlockSpec((K, N), lambda i: (0, 0))],
            out_specs=pl.BlockSpec((tm, N), lambda i: (i, 0))),
        compiler_params=pltpu.CompilerParams(dimension_semantics=("parallel",)),
    )(x2d, w2d)


def _make_lmm_kernel(tb):
    def kernel(w_ref, x_ref, o_ref):
        # out[b] = W (M,K) @ x[b] (K, TN) for every b in the batch tile
        for b in range(tb):
            o_ref[b] = jnp.dot(w_ref[...], x_ref[b],
                               preferred_element_type=jnp.float32)
    return kernel


def _left_matmul_batched(w2d, x3d, tb_cap=8, tn_cap=512):
    """out[b] = w2d @ x3d[b]; grid over (batch tiles, column tiles)."""
    M, K = w2d.shape
    B, _, N = x3d.shape
    tn = _pick_block(N, tn_cap, 128)
    tb = _pick_block(B, tb_cap, 1)
    return pl.pallas_call(
        _make_lmm_kernel(tb),
        out_shape=jax.ShapeDtypeStruct((B, M, N), jnp.float32),
        grid_spec=pltpu.PrefetchScalarGridSpec(
            num_scalar_prefetch=0, grid=(B // tb, N // tn),
            in_specs=[pl.BlockSpec((M, K), lambda b, j: (0, 0)),
                      pl.BlockSpec((tb, K, tn), lambda b, j: (b, 0, j))],
            out_specs=pl.BlockSpec((tb, M, tn), lambda b, j: (b, 0, j))),
        compiler_params=pltpu.CompilerParams(
            dimension_semantics=("parallel", "parallel")),
    )(w2d, x3d)


def _trilinear_upsample(x, out_spatial):
    """F.interpolate(x, size=out_spatial, mode='trilinear', align_corners=False)
    as three separable per-axis Pallas matmuls (no Kronecker matrix, no
    transposes -- each contraction is arranged so no data reordering is needed)."""
    n, c, d, h, w = (int(s) for s in x.shape)
    D, H, W = out_spatial
    nc = n * c
    # NOTE: operands stay f32 to match the reference bit-for-bit tolerance;
    # casting operands to bf16 (f32 accumulation) would ~2x MXU throughput.
    t = x.reshape(nc * d * h, w).astype(jnp.float32)
    t = _right_matmul(t, jnp.asarray(_linear_interp_matrix(W, w).T))       # (nc*d*h, W)
    t = t.reshape(nc * d, h, W)
    t = _left_matmul_batched(jnp.asarray(_linear_interp_matrix(H, h)), t)  # (nc*d, H, W)
    t = t.reshape(nc, d, H * W)
    t = _left_matmul_batched(jnp.asarray(_linear_interp_matrix(D, d)), t)  # (nc, D, H*W)
    return t.reshape(n, c, D, H, W)


# -------------------------------------------------- fused multi-head MSE loss

def _make_fused_mse_kernel(num_heads, weights):
    w = [float(v) for v in weights]

    def kernel(*refs):
        y_ref = refs[0]
        x_refs = refs[1:1 + num_heads]
        out_ref = refs[1 + num_heads]          # (1, 8, 128) resident accumulator
        k = pl.program_id(1)

        @pl.when(k == 0)
        def _():
            out_ref[...] = jnp.zeros_like(out_ref)

        yv = y_ref[...].astype(jnp.float32)    # y read ONCE per tile for all heads
        acc = out_ref[0]
        for i in range(num_heads):
            diff = x_refs[i][...].astype(jnp.float32) - yv
            sq = diff * diff
            # (TR,128) -> (TR/8, 8, 128) -> sum over the leading axis: plain
            # vreg adds on the VPU, no per-tile cross-lane XLU reduction.
            acc = acc + jnp.float32(w[i]) * jnp.sum(sq.reshape(-1, 8, 128), axis=0)
        out_ref[0] = acc

    return kernel


def _flatten_pad(a, rows):
    flat = a.reshape(-1)
    pad = rows * 128 - flat.shape[0]
    if pad:
        flat = jnp.pad(flat, (0, pad))          # zero pad: contributes 0 to MSE
    return flat.reshape(rows, 128)


# --------------------------------------------------------------- forward ----

def multiple_output_loss(xs, y, weight_factors=None, max_tile_rows=1024):
    """JAX/Pallas port of MultipleOutputLoss.forward
    (loss = MSE 'mean', interpolation = 'trilinear', align_corners=False)."""
    # TODO(synk): the reference module takes an arbitrary `loss` callable; it is
    # instantiated here as MSE('mean'), the standard choice for this wrapper.
    assert isinstance(xs, (tuple, list)), 'x must be either tuple or list'
    weights = ([1.0] * len(xs) if weight_factors is None
               else [float(v) for v in weight_factors])

    out_spatial = tuple(int(s) for s in y.shape[2:])
    numel = float(np.prod(y.shape))

    # Full-resolution predictions: coarse heads upsampled with separable
    # trilinear matmuls; the last head is used as-is (the module never resizes it).
    preds, w_used = [], []
    for i in range(len(xs) - 1):
        if weights[i] != 0:
            xi = xs[i]
            if tuple(int(s) for s in xi.shape[2:]) == out_spatial:
                preds.append(xi)
            else:
                preds.append(_trilinear_upsample(xi, out_spatial))
            w_used.append(weights[i])
    preds.append(xs[-1])
    w_used.append(weights[-1])

    # Lane-dense (rows, 128) slabs, rows a multiple of 8.
    ne = int(np.prod(y.shape))
    rows = ((ne + 127) // 128 + 7) // 8 * 8
    y2 = _flatten_pad(y, rows)
    x2 = [_flatten_pad(p, rows) for p in preds]

    tr = _pick_block(rows, max_tile_rows, 8)    # <= ~0.5 MiB per input buffer
    n_tiles = rows // tr
    n_par = 2 if n_tiles % 2 == 0 else 1        # shard tiles across v7x's 2 TCs
    kpp = n_tiles // n_par

    def row_map(p, k):
        return (p * kpp + k, 0)

    nh = len(preds)
    partials = pl.pallas_call(
        _make_fused_mse_kernel(nh, w_used),
        out_shape=jax.ShapeDtypeStruct((n_par, 8, 128), jnp.float32),
        grid_spec=pltpu.PrefetchScalarGridSpec(
            num_scalar_prefetch=0, grid=(n_par, kpp),
            in_specs=[pl.BlockSpec((tr, 128), row_map) for _ in range(nh + 1)],
            out_specs=pl.BlockSpec((1, 8, 128), lambda p, k: (p, 0, 0))),
        compiler_params=pltpu.CompilerParams(
            dimension_semantics=("parallel", "arbitrary")),
    )(y2, *x2)

    # Tiny epilogue: fold per-core lane partials and the 1/N of the 'mean'.
    return jnp.sum(partials) / numel


# ------------------------------------------------------------------ main ----

if __name__ == "__main__":
    key = jax.random.PRNGKey(0)
    k1, k2, k3, k4 = jax.random.split(key, 4)

    N, C, S = 2, 4, 16
    # ground truth + three deep-supervision heads (two coarse + full resolution)
    y  = jax.random.normal(k1, (N, C, S, S, S), dtype=jnp.float32)
    x0 = jax.random.normal(k2, (N, C, S // 4, S // 4, S // 4), dtype=jnp.float32)
    x1 = jax.random.normal(k3, (N, C, S // 2, S // 2, S // 2), dtype=jnp.float32)
    x2 = jax.random.normal(k4, (N, C, S, S, S), dtype=jnp.float32)
    weights = [0.25, 0.5, 1.0]

    # small max_tile_rows so the demo exercises the tiled accumulator + 2-way grid
    loss = multiple_output_loss([x0, x1, x2], y, weight_factors=weights,
                                max_tile_rows=64)
    loss = jax.block_until_ready(loss)

    # pure-JAX reference (same separable interpolation weights)
    def _ref():
        def up(x):
            D, H, W = y.shape[2:]
            _, _, d, h, w = x.shape
            mw = jnp.asarray(_linear_interp_matrix(W, w))
            mh = jnp.asarray(_linear_interp_matrix(H, h))
            md = jnp.asarray(_linear_interp_matrix(D, d))
            t = jnp.einsum('ncdhw,Ww->ncdhW', x.astype(jnp.float32), mw)
            t = jnp.einsum('ncdhW,Hh->ncdHW', t, mh)
            t = jnp.einsum('ncdHW,Dd->ncDHW', t, md)
            return t
        mse = lambda a, b: jnp.mean((a.astype(jnp.float32)
                                     - b.astype(jnp.float32)) ** 2)
        xs = [x0, x1, x2]
        l = weights[-1] * mse(xs[-1], y)
        for i in range(len(xs) - 1):
            if weights[i] != 0:
                l = l + weights[i] * mse(up(xs[i]), y)
        return l

    np.testing.assert_allclose(float(loss), float(_ref()), rtol=1e-4, atol=1e-5)
    print("KERNEL_OK")
</pallas_src>

<mosaic_0001>
module attributes {stable_mosaic.version = 11 : i64} {
  func.func @_rmm_kernel(%arg0: i32, %arg1: memref<128x4xf32, #tpu.memory_space<vmem>>, %arg2: memref<4x16xf32, #tpu.memory_space<vmem>>, %arg3: memref<128x16xf32, #tpu.memory_space<vmem>>) attributes {dimension_semantics = [#tpu.dimension_semantics<parallel>], iteration_bounds = array<i64: 1>, scalar_prefetch = 0 : i64, scratch_operands = 0 : i64, tpu.core_type = #tpu.core_type<tc>, window_params = [{transform_indices = @transform_0, window_bounds = array<i64: 128, 4>}, {pipeline_mode = #tpu.pipeline_mode<synchronous>, transform_indices = @transform_1, window_bounds = array<i64: 4, 16>}, {transform_indices = @transform_2, window_bounds = array<i64: 128, 16>}]} {
    %c0 = arith.constant 0 : index
    %c0_0 = arith.constant 0 : index
    %0 = vector.load %arg1[%c0, %c0_0] : memref<128x4xf32, #tpu.memory_space<vmem>>, vector<128x4xf32>
    %c0_1 = arith.constant 0 : index
    %c0_2 = arith.constant 0 : index
    %1 = vector.load %arg2[%c0_1, %c0_2] : memref<4x16xf32, #tpu.memory_space<vmem>>, vector<4x16xf32>
    %cst = arith.constant dense<0.000000e+00> : vector<128x16xf32>
    %2 = tpu.matmul %0, %1, %cst {dimension_numbers = #tpu.dot_dimension_numbers<[1], [0], [0], [1], [0, 0, 1, 1], [], []>} : vector<128x4xf32>, vector<4x16xf32>, vector<128x16xf32> -> vector<128x16xf32>
    %c0_3 = arith.constant 0 : index
    %c0_4 = arith.constant 0 : index
    %3 = vector.load %arg3[%c0_3, %c0_4] : memref<128x16xf32, #tpu.memory_space<vmem>>, vector<128x16xf32>
    tpu.vector_store %arg3[%c0_3, %c0_4], %2 {strides = array<i32>} : memref<128x16xf32, #tpu.memory_space<vmem>>, vector<128x16xf32>,
    return
  }
  func.func @transform_0(%arg0: i32) -> (i32, i32) {
    %c0_i32 = arith.constant 0 : i32
    %c0_i32_0 = arith.constant 0 : i32
    return %arg0, %c0_i32 : i32, i32
  }
  func.func @transform_1(%arg0: i32) -> (i32, i32) {
    %c0_i32 = arith.constant 0 : i32
    %c0_i32_0 = arith.constant 0 : i32
    %c0_i32_1 = arith.constant 0 : i32
    return %c0_i32, %c0_i32_0 : i32, i32
  }
  func.func @transform_2(%arg0: i32) -> (i32, i32) {
    %c0_i32 = arith.constant 0 : i32
    %c0_i32_0 = arith.constant 0 : i32
    return %arg0, %c0_i32 : i32, i32
  }
}

</mosaic_0001>

<bundles_post_ra>
// kernel: tpu_custom_call.1
= control target key start
LH: loop header
LB: loop body
LE: loop exit
PB: predicated region body
PF: predicated region fallthrough
CT: control target
= control target key end

     0   :  { %vm77_vm0 = vcmask 1043456   ;;  %vm28_vm1 = vcmask 31744   ;;  %vm146_vm2 = vcmask 130048   ;;  %s333_s1 = inlined_call_operand.vmem [shape: f32[4,16], index: 1, kind: input, shape index: {}]   ;;  %s334_s0 = inlined_call_operand.vmem [shape: f32[128,4], index: 0, kind: input, shape index: {}]   ;;  %s335_s2 = inlined_call_operand.vmem [shape: f32[128,16], index: 2, kind: output, shape index: {}]  }
   0x1   :  { %v27_v0 = vld [vmem:[%s333_s1] sm:$0xf]  ;;  %v20_v5 = vld [vmem:[%s334_s0 + $0x48] sm:$0xff]  ;;  %v21_v9 = vld [vmem:[%s334_s0 + $0x50] sm:$0xff] }
   0x2   :  { %v19_v1 = vld [vmem:[%s334_s0 + $0x40] sm:$0xff]  ;;  %185 = vmatpush.msk.msra.mxu2 %vm77_vm0, %v27_v0  ;;  %186 = vmatpush.msk.msra.mxu3 %vm77_vm0, %v27_v0  ;;  %v24_v6 = vld [vmem:[%s334_s0 + $0x68] sm:$0xff]  ;;  %v25_v10 = vld [vmem:[%s334_s0 + $0x70] sm:$0xff] }
   0x3   :  { %v23_v2 = vld [vmem:[%s334_s0 + $0x60] sm:$0xff]  ;;  %176 = vmatmul.msk.f32.vlgmr.msra.gmra.mxu2 %vm28_vm1, %v19_v1  ;;  %167 = vmatpush.msk.msra.mxu0 %vm77_vm0, %v27_v0  ;;  %v12_v7 = vld [vmem:[%s334_s0 + $0x8] sm:$0xff]  ;;  %v13_v11 = vld [vmem:[%s334_s0 + $0x10] sm:$0xff] }
   0x4   :  { %v11_v3 = vld [vmem:[%s334_s0] sm:$0xff]  ;;  %180 = vmatmul.msk.f32.vlgmr.msra.gmra.mxu3 %vm28_vm1, %v23_v2  ;;  %184 = vmatpush.msk.msra.mxu1 %vm77_vm0, %v27_v0  ;;  %v16_v8 = vld [vmem:[%s334_s0 + $0x28] sm:$0xff]  ;;  %v17_v12 = vld [vmem:[%s334_s0 + $0x30] sm:$0xff] }
   0x5   :  { %v15_v4 = vld [vmem:[%s334_s0 + $0x20] sm:$0xff]  ;;  %168 = vmatmul.msk.f32.vlgmr.msra.gmra.mxu0 %vm28_vm1, %v11_v3  ;;  %v22_v13 = vld [vmem:[%s334_s0 + $0x58] sm:$0xff] }
   0x6   :  { %172 = vmatmul.msk.f32.vlgmr.msra.gmra.mxu1 %vm28_vm1, %v15_v4  ;;  %v26_v14 = vld [vmem:[%s334_s0 + $0x78] sm:$0xff] }
   0x7   :  { %v14_v15 = vld [vmem:[%s334_s0 + $0x18] sm:$0xff] }
   0x8   :  { %v18_v16 = vld [vmem:[%s334_s0 + $0x38] sm:$0xff] }
   0xb   :  { %177 = vmatmul.msk.f32.gmra.mxu2 %vm28_vm1, %v20_v5 }
   0xc   :  { %181 = vmatmul.msk.f32.gmra.mxu3 %vm28_vm1, %v24_v6 }
   0xd   :  { %169 = vmatmul.msk.f32.gmra.mxu0 %vm28_vm1, %v12_v7 }
   0xe   :  { %173 = vmatmul.msk.f32.gmra.mxu1 %vm28_vm1, %v16_v8 }
  0x13   :  { %178 = vmatmul.msk.f32.gmra.mxu2 %vm28_vm1, %v21_v9 }
  0x14   :  { %182 = vmatmul.msk.f32.gmra.mxu3 %vm28_vm1, %v25_v10 }
  0x15   :  { %170 = vmatmul.msk.f32.gmra.mxu0 %vm28_vm1, %v13_v11 }
  0x16   :  { %174 = vmatmul.msk.f32.gmra.mxu1 %vm28_vm1, %v17_v12 }
  0x1b   :  { %179 = vmatmul.msk.f32.gmra.mxu2 %vm28_vm1, %v22_v13 }
  0x1c   :  { %183 = vmatmul.msk.f32.gmra.mxu3 %vm28_vm1, %v26_v14 }
  0x1d   :  { %171 = vmatmul.msk.f32.gmra.mxu0 %vm28_vm1, %v14_v15 }
  0x1e   :  { %175 = vmatmul.msk.f32.gmra.mxu1 %vm28_vm1, %v18_v16 }
  0x82   :  { %v98_v17 = vpop.f32.mrf.mxu0 }
  0x83   :  { %v110_v18 = vpop.f32.mrf.mxu1  ;;  %147 = vst.msk [vmem:[%s335_s2] sm:$0xff] %vm146_vm2, %v98_v17 }
  0x84   :  { %151 = vst.msk [vmem:[%s335_s2 + $0x20] sm:$0xff] %vm146_vm2, %v110_v18 }
  0x86   :  { %v122_v19 = vpop.f32.mrf.mxu2 }
  0x87   :  { %v134_v20 = vpop.f32.mrf.mxu3  ;;  %155 = vst.msk [vmem:[%s335_s2 + $0x40] sm:$0xff] %vm146_vm2, %v122_v19 }
  0x88   :  { %159 = vst.msk [vmem:[%s335_s2 + $0x60] sm:$0xff] %vm146_vm2, %v134_v20 }
  0x8a   :  { %v101_v21 = vpop.f32.mrf.mxu0 }
  0x8b   :  { %v113_v22 = vpop.f32.mrf.mxu1  ;;  %148 = vst.msk [vmem:[%s335_s2 + $0x8] sm:$0xff] %vm146_vm2, %v101_v21 }
  0x8c   :  { %152 = vst.msk [vmem:[%s335_s2 + $0x28] sm:$0xff] %vm146_vm2, %v113_v22 }
  0x8e   :  { %v125_v23 = vpop.f32.mrf.mxu2 }
  0x8f   :  { %v137_v24 = vpop.f32.mrf.mxu3  ;;  %156 = vst.msk [vmem:[%s335_s2 + $0x48] sm:$0xff] %vm146_vm2, %v125_v23 }
  0x90   :  { %160 = vst.msk [vmem:[%s335_s2 + $0x68] sm:$0xff] %vm146_vm2, %v137_v24 }
  0x92   :  { %v104_v25 = vpop.f32.mrf.mxu0 }
  0x93   :  { %v116_v26 = vpop.f32.mrf.mxu1  ;;  %149 = vst.msk [vmem:[%s335_s2 + $0x10] sm:$0xff] %vm146_vm2, %v104_v25 }
  0x94   :  { %153 = vst.msk [vmem:[%s335_s2 + $0x30] sm:$0xff] %vm146_vm2, %v116_v26 }
  0x96   :  { %v128_v27 = vpop.f32.mrf.mxu2 }
  0x97   :  { %v140_v28 = vpop.f32.mrf.mxu3  ;;  %157 = vst.msk [vmem:[%s335_s2 + $0x50] sm:$0xff] %vm146_vm2, %v128_v27 }
  0x98   :  { %161 = vst.msk [vmem:[%s335_s2 + $0x70] sm:$0xff] %vm146_vm2, %v140_v28 }
  0x9a   :  { %v107_v29 = vpop.f32.mrf.mxu0 }
  0x9b   :  { %v119_v30 = vpop.f32.mrf.mxu1  ;;  %150 = vst.msk [vmem:[%s335_s2 + $0x18] sm:$0xff] %vm146_vm2, %v107_v29 }
  0x9c   :  { %154 = vst.msk [vmem:[%s335_s2 + $0x38] sm:$0xff] %vm146_vm2, %v119_v30 }
  0x9e   :  { %v131_v31 = vpop.f32.mrf.mxu2 }
  0x9f   :  { %v143_v32 = vpop.f32.mrf.mxu3  ;;  %158 = vst.msk [vmem:[%s335_s2 + $0x58] sm:$0xff] %vm146_vm2, %v131_v31 }
  0xa0   :  { %162 = vst.msk [vmem:[%s335_s2 + $0x78] sm:$0xff] %vm146_vm2, %v143_v32 }

</bundles_post_ra>
